<compile_context>
chip_gen: v7x
topology: tpu7x:2x2x1
jax: 0.10.0
libtpu: 0.0.40
codegen_flags: <defaults>
</compile_context>

<pallas_src>
import jax
import jax.numpy as jnp
from jax import lax
from jax.experimental import pallas as pl
from jax.experimental.pallas import tpu as pltpu


def _round_up(x, m):
    return (x + m - 1) // m * m


def _vmem_limit_bytes(data_bytes):
    """Scoped-VMEM limit sized to the footprint, capped below physical VMEM
    (leaves ~16 MiB headroom: ~48 MiB cap on v7x, ~112 MiB on v5e/v6e)."""
    try:
        cap = int(getattr(pltpu.get_tpu_info(), "vmem_capacity_bytes", 128 << 20))
    except Exception:
        cap = 64 << 20
    hard_cap = max(cap - (16 << 20), 32 << 20)
    limit = 2 * int(data_bytes) + (8 << 20)
    return int(min(max(limit, 16 << 20), hard_cap))


def _pad_gate_blocks(w, h, hp):
    """Zero-pad each of the 4 torch-LSTM gate blocks (i,f,g,o) along the last
    axis from H to Hp.  Padded hidden units see zero weights and zero bias, so
    (starting from h=c=0) they stay exactly 0 and never leak into real units."""
    if hp == h:
        return w
    pads = [(0, 0)] * (w.ndim - 1) + [(0, hp - h)]
    return jnp.concatenate(
        [jnp.pad(w[..., k * h:(k + 1) * h], pads) for k in range(4)], axis=-1)


def _sigmoid(x):
    # sigmoid = 1 / (1 + exp(-x)); exp on EUP, reciprocal on EUP via vrcp
    # (approx) -> cheap on the serial chain, f32 values kept (v5e-safe).
    return pl.reciprocal(1.0 + jnp.exp(-x), approx=True)


# --------------------------------------------------------------------------
# Parallel matmul + bias (used for the input projection and output projection)
# --------------------------------------------------------------------------
def _matmul_bias_kernel(x_ref, w_ref, b_ref, o_ref):
    o_ref[...] = (jnp.dot(x_ref[...], w_ref[...],
                          preferred_element_type=jnp.float32)
                  + b_ref[...]).astype(o_ref.dtype)


def _matmul_bias(x, w, b, out_dtype):
    """out = x @ w + b.  Grid order (n, m): the weight column-tile is held
    across the inner m sweep (fetched exactly once per n); when M is small the
    whole x operand stays resident (constant block index -> fetched once), so
    the large weight is never re-streamed."""
    M, K = x.shape
    _, N = w.shape

    TN = 128
    for cand in (1024, 512, 256):
        if N % cand == 0:
            TN = cand
            break
    TM = M if M <= 1024 else 512
    Mp = _round_up(M, TM)
    if Mp > M:
        x = jnp.pad(x, ((0, Mp - M), (0, 0)))

    out_isize = jnp.dtype(out_dtype).itemsize
    data_bytes = (2 * TM * K * x.dtype.itemsize
                  + 2 * K * TN * w.dtype.itemsize
                  + 2 * TN * 4
                  + 2 * TM * TN * out_isize)

    out = pl.pallas_call(
        _matmul_bias_kernel,
        out_shape=jax.ShapeDtypeStruct((Mp, N), out_dtype),
        grid_spec=pltpu.PrefetchScalarGridSpec(
            num_scalar_prefetch=0,
            grid=(N // TN, Mp // TM),
            in_specs=[
                pl.BlockSpec((TM, K), lambda n, m: (m, 0)),
                pl.BlockSpec((K, TN), lambda n, m: (0, n)),
                pl.BlockSpec((1, TN), lambda n, m: (0, n)),
            ],
            out_specs=pl.BlockSpec((TM, TN), lambda n, m: (m, n)),
        ),
        compiler_params=pltpu.CompilerParams(
            dimension_semantics=("parallel", "parallel"),
            vmem_limit_bytes=_vmem_limit_bytes(data_bytes)),
    )(x, w, b)
    return out[:M]


# --------------------------------------------------------------------------
# Recurrent LSTM kernel: gates = gates_x[t] + h @ W_hh   (serial in time)
# --------------------------------------------------------------------------
def _lstm_recurrent_kernel(gx_ref, whh_ref, h_out_ref, h_sc, c_sc):
    """gx_ref   : (TB, BB, 4Hp) f32   precomputed x@W_ih + b for this block
       whh_ref  : (Hp, 4Hp)     bf16  recurrent weight (single-buffered)
       h_out_ref: (TB, BB, Hp)  bf16  hidden states for this block
       h_sc,c_sc: (BB, Hp)      f32   persistent LSTM state (VMEM scratch)"""
    # Time is grid axis 1 (inner); reset state at the start of every batch block.
    @pl.when(pl.program_id(1) == 0)
    def _():
        h_sc[...] = jnp.zeros_like(h_sc)
        c_sc[...] = jnp.zeros_like(c_sc)

    tb = gx_ref.shape[0]
    hp = h_sc.shape[1]
    whh = whh_ref[...]                         # hoisted once per grid step

    def step(i, carry):
        gates = gx_ref[i] + jnp.dot(h_sc[...].astype(jnp.bfloat16), whh,
                                    preferred_element_type=jnp.float32)
        i_g = _sigmoid(gates[:, 0 * hp:1 * hp])
        f_g = _sigmoid(gates[:, 1 * hp:2 * hp])
        g_g = jnp.tanh(gates[:, 2 * hp:3 * hp])
        o_g = _sigmoid(gates[:, 3 * hp:4 * hp])
        c_new = f_g * c_sc[...] + i_g * g_g
        h_new = o_g * jnp.tanh(c_new)
        c_sc[...] = c_new
        h_sc[...] = h_new
        h_out_ref[i] = h_new.astype(h_out_ref.dtype)
        return carry

    # Modest unroll keeps LLO scheduling visibility while capping vreg pressure.
    lax.fori_loop(0, tb, step, 0, unroll=min(8, tb))


# --------------------------------------------------------------------------
# Forward pass
# --------------------------------------------------------------------------
def decoder_rnn_forward(params, features, captions):
    """Replicates DecoderRNN.forward.

    features: (B, E) float32
    captions: (B, L) int32
    returns : (B, L, V) float32   (T = L: captions[:, :-1] plus the image feature)
    """
    emb_table = params["embedding"]          # (V, E)
    w_ih_t = params["w_ih_t"]                # (E, 4H)
    w_hh_t = params["w_hh_t"]                # (H, 4H)
    b_lstm = params["b_lstm"]                # (1, 4H) = b_ih + b_hh
    w_out_t = params["w_out_t"]              # (H, V)
    b_out = params["b_out"]                  # (1, V)

    B, E = features.shape
    H = w_hh_t.shape[0]
    V = w_out_t.shape[1]

    # ---- glue: embedding lookup + prepend image feature ----
    embedds = emb_table[captions[:, :-1]]                          # (B, L-1, E)
    x = jnp.concatenate([features[:, None, :], embedds], axis=1)   # (B, T, E)
    T = x.shape[1]

    # ---- TPU-friendly padded sizes ----
    num_b_blocks = 2 if B >= 16 else 1        # v7x: split batch across both TCs
    BB = _round_up(-(-B // num_b_blocks), 8)  # per-block batch (sublane tile)
    Bp = BB * num_b_blocks
    Ep = _round_up(E, 128)
    Hp = _round_up(H, 128)
    Vp = _round_up(V, 128)
    TB_TIME = min(32, _round_up(T, 8))        # time steps per serial grid step
    Tp = _round_up(T, TB_TIME)
    # TODO(synk): padded tail time steps (Tp - T) run full (discarded) LSTM
    # steps; recurrence only flows forward so results are unaffected.

    x_tm = jnp.transpose(x, (1, 0, 2))                             # (T, B, E)
    x_tm = jnp.pad(x_tm, ((0, Tp - T), (0, Bp - B), (0, Ep - E)))
    x_tm = x_tm.astype(jnp.bfloat16)

    # Padded weights (per-gate padding keeps torch [i,f,g,o] layout).
    w_ih_p = jnp.pad(_pad_gate_blocks(w_ih_t, H, Hp),
                     ((0, Ep - E), (0, 0))).astype(jnp.bfloat16)    # (Ep, 4Hp)
    w_hh_p = jnp.pad(_pad_gate_blocks(w_hh_t, H, Hp),
                     ((0, Hp - H), (0, 0))).astype(jnp.bfloat16)    # (Hp, 4Hp)
    b_p = _pad_gate_blocks(b_lstm, H, Hp).astype(jnp.float32)       # (1, 4Hp)
    w_out_p = jnp.pad(w_out_t, ((0, Hp - H), (0, Vp - V))).astype(jnp.bfloat16)
    b_out_p = jnp.pad(b_out, ((0, 0), (0, Vp - V))).astype(jnp.float32)

    M = Tp * Bp

    # ---- kernel A: input projection (parallel) — gates_x = x @ W_ih + b ----
    gates_x = _matmul_bias(x_tm.reshape(M, Ep), w_ih_p, b_p,
                           out_dtype=jnp.float32)                  # (M, 4Hp) f32
    gates_x = gates_x.reshape(Tp, Bp, 4 * Hp)

    # ---- kernel B: recurrent LSTM over (batch blocks, time blocks) ----
    num_t_blocks = Tp // TB_TIME
    lstm_bytes = (2 * TB_TIME * BB * 4 * Hp * 4     # gates_x blocks (f32, x2)
                  + Hp * 4 * Hp * 2                 # W_hh (bf16, single-buffered)
                  + 2 * TB_TIME * BB * Hp * 2       # h out blocks (bf16, x2)
                  + 2 * BB * Hp * 4)                # h/c scratch
    h_all = pl.pallas_call(
        _lstm_recurrent_kernel,
        out_shape=jax.ShapeDtypeStruct((Tp, Bp, Hp), jnp.bfloat16),
        grid_spec=pltpu.PrefetchScalarGridSpec(
            num_scalar_prefetch=0,
            grid=(num_b_blocks, num_t_blocks),
            in_specs=[
                pl.BlockSpec((TB_TIME, BB, 4 * Hp), lambda b, t: (t, b, 0)),
                pl.BlockSpec((Hp, 4 * Hp), lambda b, t: (0, 0),
                             pipeline_mode=pl.Buffered(1)),  # constant -> 1 buffer
            ],
            out_specs=pl.BlockSpec((TB_TIME, BB, Hp), lambda b, t: (t, b, 0)),
            scratch_shapes=[pltpu.VMEM((BB, Hp), jnp.float32),   # h state
                            pltpu.VMEM((BB, Hp), jnp.float32)],  # c state
        ),
        compiler_params=pltpu.CompilerParams(
            dimension_semantics=("parallel", "arbitrary"),   # batch par, time serial
            vmem_limit_bytes=_vmem_limit_bytes(lstm_bytes)),
    )(gates_x, w_hh_p)

    # ---- kernel C: output projection (parallel) — logits = h @ W_out + b ----
    logits_flat = _matmul_bias(h_all.reshape(M, Hp), w_out_p, b_out_p,
                               out_dtype=jnp.float32)              # (M, Vp) f32

    logits = logits_flat.reshape(Tp, Bp, Vp)
    logits = jnp.transpose(logits, (1, 0, 2))[:B, :T, :V]          # (B, T, V)
    return logits


# --------------------------------------------------------------------------
# Pure-JAX f32 reference (lax.scan LSTM) matching torch semantics.
# --------------------------------------------------------------------------
def _reference_forward(params, features, captions):
    emb_table = params["embedding"]
    w_ih_t, w_hh_t = params["w_ih_t"], params["w_hh_t"]
    b_lstm = params["b_lstm"][0]
    w_out_t, b_out = params["w_out_t"], params["b_out"][0]
    B, E = features.shape
    H = w_hh_t.shape[0]

    embedds = emb_table[captions[:, :-1]]
    x = jnp.concatenate([features[:, None, :], embedds], axis=1)
    x_tm = jnp.transpose(x, (1, 0, 2))

    def step(carry, x_t):
        h, c = carry
        gates = x_t @ w_ih_t + h @ w_hh_t + b_lstm
        i = jax.nn.sigmoid(gates[:, 0 * H:1 * H])
        f = jax.nn.sigmoid(gates[:, 1 * H:2 * H])
        g = jnp.tanh(gates[:, 2 * H:3 * H])
        o = jax.nn.sigmoid(gates[:, 3 * H:4 * H])
        c = f * c + i * g
        h = o * jnp.tanh(c)
        return (h, c), h @ w_out_t + b_out

    init = (jnp.zeros((B, H), jnp.float32), jnp.zeros((B, H), jnp.float32))
    _, out_tm = lax.scan(step, init, x_tm)
    return jnp.transpose(out_tm, (1, 0, 2))


def init_params(key, embed_size, hidden_size, vocab_size):
    ks = jax.random.split(key, 7)
    s = 0.1
    return {
        "embedding": jax.random.normal(ks[0], (vocab_size, embed_size), jnp.float32) * s,
        "w_ih_t":    jax.random.normal(ks[1], (embed_size, 4 * hidden_size), jnp.float32) * s,
        "w_hh_t":    jax.random.normal(ks[2], (hidden_size, 4 * hidden_size), jnp.float32) * s,
        "b_lstm":    (jax.random.normal(ks[3], (1, 4 * hidden_size), jnp.float32) * s
                      + jax.random.normal(ks[4], (1, 4 * hidden_size), jnp.float32) * s),
        "w_out_t":   jax.random.normal(ks[5], (hidden_size, vocab_size), jnp.float32) * s,
        "b_out":     jax.random.normal(ks[6], (1, vocab_size), jnp.float32) * s,
    }


if __name__ == "__main__":
    EMBED, HIDDEN, VOCAB = 32, 32, 64
    B, L = 2, 8   # captions length L -> LSTM sequence length T = L

    key = jax.random.PRNGKey(0)
    kp, kf, kc = jax.random.split(key, 3)

    params = init_params(kp, EMBED, HIDDEN, VOCAB)
    features = jax.random.normal(kf, (B, EMBED), jnp.float32)
    captions = jax.random.randint(kc, (B, L), 0, VOCAB, dtype=jnp.int32)

    out = decoder_rnn_forward(params, features, captions)
    out = jax.block_until_ready(out)

    ref = _reference_forward(params, features, captions)
    assert out.shape == (B, L, VOCAB)
    max_err = float(jnp.max(jnp.abs(out - ref)))
    # bf16 matmul operands (f32 accumulation) + approx-reciprocal sigmoid ->
    # loose-but-safe tolerance.
    assert max_err < 2e-2, f"mismatch vs reference: max abs err {max_err}"

    print("KERNEL_OK")
</pallas_src>

<mosaic_0001>
module attributes {stable_mosaic.version = 11 : i64} {
  func.func @_matmul_bias_kernel(%arg0: i32, %arg1: i32, %arg2: memref<64x128xbf16, #tpu.memory_space<vmem>>, %arg3: memref<128x512xbf16, #tpu.memory_space<vmem>>, %arg4: memref<1x512xf32, #tpu.memory_space<vmem>>, %arg5: memref<64x512xf32, #tpu.memory_space<vmem>>) attributes {dimension_semantics = [#tpu.dimension_semantics<parallel>, #tpu.dimension_semantics<parallel>], iteration_bounds = array<i64: 1, 1>, scalar_prefetch = 0 : i64, scratch_operands = 0 : i64, tpu.core_type = #tpu.core_type<tc>, window_params = [{transform_indices = @transform_0, window_bounds = array<i64: 64, 128>}, {transform_indices = @transform_1, window_bounds = array<i64: 128, 512>}, {transform_indices = @transform_2, window_bounds = array<i64: 1, 512>}, {transform_indices = @transform_3, window_bounds = array<i64: 64, 512>}]} {
    %c0 = arith.constant 0 : index
    %c0_0 = arith.constant 0 : index
    %0 = vector.load %arg2[%c0, %c0_0] : memref<64x128xbf16, #tpu.memory_space<vmem>>, vector<64x128xbf16>
    %c0_1 = arith.constant 0 : index
    %c0_2 = arith.constant 0 : index
    %1 = vector.load %arg3[%c0_1, %c0_2] : memref<128x512xbf16, #tpu.memory_space<vmem>>, vector<128x512xbf16>
    %cst = arith.constant dense<0.000000e+00> : vector<64x512xf32>
    %2 = tpu.matmul %0, %1, %cst {dimension_numbers = #tpu.dot_dimension_numbers<[1], [0], [0], [1], [0, 0, 1, 1], [], []>} : vector<64x128xbf16>, vector<128x512xbf16>, vector<64x512xf32> -> vector<64x512xf32>
    %c0_3 = arith.constant 0 : index
    %c0_4 = arith.constant 0 : index
    %3 = vector.load %arg4[%c0_3, %c0_4] : memref<1x512xf32, #tpu.memory_space<vmem>>, vector<1x512xf32>
    %4 = vector.broadcast %3 : vector<1x512xf32> to vector<64x512xf32>
    %5 = arith.addf %2, %4 : vector<64x512xf32>
    %c0_5 = arith.constant 0 : index
    %c0_6 = arith.constant 0 : index
    %6 = vector.load %arg5[%c0_5, %c0_6] : memref<64x512xf32, #tpu.memory_space<vmem>>, vector<64x512xf32>
    tpu.vector_store %arg5[%c0_5, %c0_6], %5 {strides = array<i32>} : memref<64x512xf32, #tpu.memory_space<vmem>>, vector<64x512xf32>,
    return
  }
  func.func @transform_0(%arg0: i32, %arg1: i32) -> (i32, i32) {
    %c0_i32 = arith.constant 0 : i32
    %c0_i32_0 = arith.constant 0 : i32
    return %arg1, %c0_i32 : i32, i32
  }
  func.func @transform_1(%arg0: i32, %arg1: i32) -> (i32, i32) {
    %c0_i32 = arith.constant 0 : i32
    %c0_i32_0 = arith.constant 0 : i32
    return %c0_i32, %arg0 : i32, i32
  }
  func.func @transform_2(%arg0: i32, %arg1: i32) -> (i32, i32) {
    %c0_i32 = arith.constant 0 : i32
    %c0_i32_0 = arith.constant 0 : i32
    return %c0_i32, %arg0 : i32, i32
  }
  func.func @transform_3(%arg0: i32, %arg1: i32) -> (i32, i32) {
    %c0_i32 = arith.constant 0 : i32
    return %arg1, %arg0 : i32, i32
  }
}

</mosaic_0001>

<bundles_post_ra>
// kernel: tpu_custom_call.1
= control target key start
LH: loop header
LB: loop body
LE: loop exit
PB: predicated region body
PF: predicated region fallthrough
CT: control target
= control target key end

     0   :  { %8 = vsyncpa [#allocation3], 0  ;;  %s773_s0 = inlined_call_operand.hbm [shape: bf16[64,128], index: 0, kind: input, shape index: {}]   ;;  %s774_s1 = inlined_call_operand.hbm [shape: bf16[128,512], index: 1, kind: input, shape index: {}]   ;;  %s775_s2 = inlined_call_operand.vmem [shape: f32[1,512], index: 2, kind: input, shape index: {}]   ;;  %s776_s3 = inlined_call_operand.hbm [shape: f32[64,512], index: 3, kind: output, shape index: {}]  }
   0x1   :  { %9 = vsyncpa [#allocation6], 0 }
   0x2   :  { %10 = vsyncpa [#allocation4], 0  ;;  %s656_s12 = smov [#allocation2]   ;;  %s584_s16 = scalar_lea.hbm %s773_s0, 512 }
   0x3   :  { %s16_s13 = sshll.u32 %s656_s12, 4  ;;  %p585_p0 = scmp.ne.s32.totalorder %s773_s0, %s584_s16  ;;  %s17_s13 = int_to_ptr.vmem [resolvable:$true] %s16_s13 }
   0x4   :  { %p588_p1 = scmp.lt.u32.totalorder %s584_s16, %s773_s0 }
   0x6   :  { %p590_p2 = pnand %p588_p1, %p585_p0 }
   0x8   :  { %593 = shalt.err (!%p590_p2)
}
   0x9   :  { %s594_s21 = scalar_lea.vmem %s17_s13, 512  ;;  %p599_p4 = scmp.lt.s32.totalorder %s17_s13, %s17_s13 }
   0xa   :  { %p595_p3 = scmp.ne.s32.totalorder %s17_s13, %s594_s21  ;;  %p600_p5 = scmp.lt.s32.totalorder %s594_s21, %s594_s21 }
   0xc   :  { %p601_p6 = por %p600_p5, %p599_p4 }
   0xe   :  { %p602_p7 = pnand %p601_p6, %p595_p3 }
  0x10   :  { %605 = shalt.err (!%p602_p7)
}
  0x11   :  { %s657_s22 = smov 64   ;;  %s658_s23 = smov 4  }
  0x12   :  { %22 = dma.hbm_to_vmem [thread:$0]  %s773_s0, 512, %s17_s13, [#allocation3], %s657_s22, %s657_s22, %s658_s23  }
  0x13   :  { %s659_s26 = smov [#allocation5]   ;;  %s606_s30 = scalar_lea.hbm %s774_s1, 4096 }
  0x14   :  { %s28_s27 = sshll.u32 %s659_s26, 4  ;;  %p607_p8 = scmp.ne.s32.totalorder %s774_s1, %s606_s30  ;;  %s29_s27 = int_to_ptr.vmem [resolvable:$true] %s28_s27 }
  0x15   :  { %p610_p9 = scmp.lt.u32.totalorder %s606_s30, %s774_s1 }
  0x17   :  { %p612_p10 = pnand %p610_p9, %p607_p8 }
  0x19   :  { %615 = shalt.err (!%p612_p10)
}
  0x1a   :  { %s616_s8 = scalar_lea.vmem %s29_s27, 4096  ;;  %p621_p12 = scmp.lt.s32.totalorder %s29_s27, %s29_s27 }
  0x1b   :  { %p617_p11 = scmp.ne.s32.totalorder %s29_s27, %s616_s8  ;;  %p622_p13 = scmp.lt.s32.totalorder %s616_s8, %s616_s8 }
  0x1d   :  { %p623_p0 = por %p622_p13, %p621_p12 }
  0x1f   :  { %p624_p1 = pnand %p623_p0, %p617_p11 }
  0x21   :  { %627 = shalt.err (!%p624_p1)
}
  0x22   :  { %s660_s0 = smov 256   ;;  %s661_s9 = smov 16  }
  0x23   :  { %34 = dma.hbm_to_vmem [thread:$0]  %s774_s1, 4096, %s29_s27, [#allocation6], %s660_s0, %s660_s0, %s661_s9  }
  0x24   :  { %650 = dma.done.wait [#allocation3], 512  }
  0x25   :  { %651 = vsyncadd [#allocation3], 4294966784 }
  0x26   :  { %652 = dma.done.wait [#allocation6], 4096  }
  0x27   :  { %653 = vsyncadd [#allocation6], 4294963200  ;;  %v662_v0 = vmov 0   ;;  %v532_v1 = vld [vmem:[#allocation5 + $0x4] ss:$16 sps:$4 sm:$0xff]   ;;  %v581_v34 = vld [vmem:[#allocation2 + $0x8] sm:$0xff]   ;;  %v86_v37 = vlaneseq }
  0x28   :  { %322 = vmatprep.mubr.bf16.mxu0 %v662_v0  ;;  %395 = vmatprep.mubr.bf16.mxu1 %v662_v0  ;;  %v534_v2 = vld [vmem:[#allocation5 + $0xc] ss:$16 sps:$4 sm:$0xff]   ;;  %v536_v3 = vld [vmem:[#allocation5] ss:$16 sps:$4 sm:$0xff]   ;;  %v537_v4 = vld [vmem:[#allocation5 + $0x8] ss:$16 sps:$4 sm:$0xff]  }
  0x29   :  { %290 = vmatprep.subr.bf16.mxu0 %v532_v1  ;;  %363 = vmatprep.subr.bf16.mxu1 %v534_v2  ;;  %v538_v5 = vld [vmem:[#allocation5 + $0x24] ss:$16 sps:$4 sm:$0xff]   ;;  %v540_v6 = vld [vmem:[#allocation5 + $0x2c] ss:$16 sps:$4 sm:$0xff]   ;;  %v542_v7 = vld [vmem:[#allocation5 + $0x20] ss:$16 sps:$4 sm:$0xff]  }
  0x2a   :  { %291 = vmatpush1.bf16.msra.mxu0 %v536_v3  ;;  %364 = vmatpush1.bf16.msra.mxu1 %v537_v4  ;;  %v543_v8 = vld [vmem:[#allocation5 + $0x28] ss:$16 sps:$4 sm:$0xff]   ;;  %v544_v9 = vld [vmem:[#allocation5 + $0x44] ss:$16 sps:$4 sm:$0xff]   ;;  %v546_v10 = vld [vmem:[#allocation5 + $0x4c] ss:$16 sps:$4 sm:$0xff]  }
  0x2b   :  { %292 = vmatprep.subr.bf16.mxu0 %v538_v5  ;;  %365 = vmatprep.subr.bf16.mxu1 %v540_v6  ;;  %v548_v11 = vld [vmem:[#allocation5 + $0x40] ss:$16 sps:$4 sm:$0xff]   ;;  %v549_v12 = vld [vmem:[#allocation5 + $0x48] ss:$16 sps:$4 sm:$0xff]   ;;  %v550_v13 = vld [vmem:[#allocation5 + $0x64] ss:$16 sps:$4 sm:$0xff]  }
  0x2c   :  { %v552_v14 = vld [vmem:[#allocation5 + $0x6c] ss:$16 sps:$4 sm:$0xff]   ;;  %v554_v15 = vld [vmem:[#allocation5 + $0x60] ss:$16 sps:$4 sm:$0xff]   ;;  %v555_v16 = vld [vmem:[#allocation5 + $0x68] ss:$16 sps:$4 sm:$0xff]  }
  0x2d   :  { %v556_v17 = vld [vmem:[#allocation5 + $0x84] ss:$16 sps:$4 sm:$0xff]   ;;  %v558_v18 = vld [vmem:[#allocation5 + $0x8c] ss:$16 sps:$4 sm:$0xff]   ;;  %v560_v19 = vld [vmem:[#allocation5 + $0x80] ss:$16 sps:$4 sm:$0xff]  }
  0x2e   :  { %293 = vmatpush1.bf16.msra.mxu0 %v542_v7  ;;  %366 = vmatpush1.bf16.msra.mxu1 %v543_v8  ;;  %v561_v20 = vld [vmem:[#allocation5 + $0x88] ss:$16 sps:$4 sm:$0xff]   ;;  %v562_v21 = vld [vmem:[#allocation5 + $0xa4] ss:$16 sps:$4 sm:$0xff]   ;;  %v564_v22 = vld [vmem:[#allocation5 + $0xac] ss:$16 sps:$4 sm:$0xff]  }
  0x2f   :  { %294 = vmatprep.subr.bf16.mxu0 %v544_v9  ;;  %367 = vmatprep.subr.bf16.mxu1 %v546_v10  ;;  %v566_v23 = vld [vmem:[#allocation5 + $0xa0] ss:$16 sps:$4 sm:$0xff]   ;;  %v567_v24 = vld [vmem:[#allocation5 + $0xa8] ss:$16 sps:$4 sm:$0xff]   ;;  %v568_v25 = vld [vmem:[#allocation5 + $0xc4] ss:$16 sps:$4 sm:$0xff]  }
  0x30   :  { %v570_v26 = vld [vmem:[#allocation5 + $0xcc] ss:$16 sps:$4 sm:$0xff]   ;;  %v572_v27 = vld [vmem:[#allocation5 + $0xc0] ss:$16 sps:$4 sm:$0xff]   ;;  %v573_v28 = vld [vmem:[#allocation5 + $0xc8] ss:$16 sps:$4 sm:$0xff]  }
  0x31   :  { %v574_v29 = vld [vmem:[#allocation5 + $0xe4] ss:$16 sps:$4 sm:$0xff]   ;;  %v576_v30 = vld [vmem:[#allocation5 + $0xec] ss:$16 sps:$4 sm:$0xff]   ;;  %v578_v31 = vld [vmem:[#allocation5 + $0xe0] ss:$16 sps:$4 sm:$0xff]  }
  0x32   :  { %295 = vmatpush1.bf16.msra.mxu0 %v548_v11  ;;  %368 = vmatpush1.bf16.msra.mxu1 %v549_v12  ;;  %v579_v32 = vld [vmem:[#allocation5 + $0xe8] ss:$16 sps:$4 sm:$0xff]   ;;  %v580_v33 = vld [vmem:[#allocation2] sm:$0xff]   ;;  %v582_v35 = vld [vmem:[#allocation2 + $0x10] sm:$0xff]   ;;  %v87_v38 = vshrl.u32 %v86_v37, 7 }
  0x33   :  { %296 = vmatprep.subr.bf16.mxu0 %v550_v13  ;;  %369 = vmatprep.subr.bf16.mxu1 %v552_v14  ;;  %v583_v36 = vld [vmem:[#allocation2 + $0x18] sm:$0xff]   ;;  %v84_v41 = vld [vmem:[%s775_s2] sm:$0xf]  ;;  %s663_s2 = smov [#allocation7]  }
  0x34   :  { %v88_v39 = vsub.s32 0, %v87_v38  ;;  %v96_v40 = vsub.s32 2, %v87_v38  ;;  %v92_v42 = vsub.s32 1, %v87_v38  ;;  %v100_v43 = vsub.s32 3, %v87_v38  ;;  %s473_s13 = sshll.u32 %s663_s2, 4  ;;  %s474_s13 = int_to_ptr.vmem [resolvable:$true] %s473_s13 }
  0x35   :  { %s628_s14 = scalar_lea.vmem %s474_s13, 4096  ;;  %p633_p3 = scmp.lt.s32.totalorder %s474_s13, %s474_s13 }
  0x36   :  { %297 = vmatpush1.bf16.msra.mxu0 %v554_v15  ;;  %370 = vmatpush1.bf16.msra.mxu1 %v555_v16  ;;  %v721_v44 = vrot.slane %v84_v41, %v88_v39  ;;  %v723_v45 = vrot.slane %v84_v41, %v96_v40  ;;  %v725_v46 = vrot.slane %v84_v41, %v92_v42  ;;  %p629_p2 = scmp.ne.s32.totalorder %s474_s13, %s628_s14  ;;  %p634_p4 = scmp.lt.s32.totalorder %s628_s14, %s628_s14 }
  0x37   :  { %298 = vmatprep.subr.bf16.mxu0 %v556_v17  ;;  %371 = vmatprep.subr.bf16.mxu1 %v558_v18  ;;  %v727_v47 = vrot.slane %v84_v41, %v100_v43 }
  0x38   :  { %p635_p5 = por %p634_p4, %p633_p3 }
  0x3a   :  { %299 = vmatpush1.bf16.msra.mxu0 %v560_v19  ;;  %372 = vmatpush1.bf16.msra.mxu1 %v561_v20  ;;  %p636_p6 = pnand %p635_p5, %p629_p2 }
  0x3b   :  { %300 = vmatprep.subr.bf16.mxu0 %v562_v21  ;;  %373 = vmatprep.subr.bf16.mxu1 %v564_v22 }
  0x3e   :  { %301 = vmatpush1.bf16.msra.mxu0 %v566_v23  ;;  %374 = vmatpush1.bf16.msra.mxu1 %v567_v24 }
  0x3f   :  { %302 = vmatprep.subr.bf16.mxu0 %v568_v25  ;;  %375 = vmatprep.subr.bf16.mxu1 %v570_v26 }
  0x42   :  { %303 = vmatpush1.bf16.msra.mxu0 %v572_v27  ;;  %376 = vmatpush1.bf16.msra.mxu1 %v573_v28 }
  0x43   :  { %304 = vmatprep.subr.bf16.mxu0 %v574_v29  ;;  %377 = vmatprep.subr.bf16.mxu1 %v576_v30 }
  0x46   :  { %305 = vmatpush1.bf16.msra.mxu0 %v578_v31  ;;  %378 = vmatpush1.bf16.msra.mxu1 %v579_v32 }
  0x49   :  { %323 = vmatmul.mubr.bf16.vlgmr.msra.gmra.mrb[0].mxu0 %v580_v33  ;;  %396 = vmatmul.mubr.bf16.vlgmr.msra.gmra.mrb[0].mxu1 %v580_v33 }
  0x4a   :  { %332 = vmatprep.mubr.bf16.mxu0 %v662_v0  ;;  %405 = vmatprep.mubr.bf16.mxu1 %v662_v0 }
  0x51   :  { %333 = vmatmul.mubr.bf16.gmra.mrb[4].mxu0 %v581_v34  ;;  %406 = vmatmul.mubr.bf16.gmra.mrb[4].mxu1 %v581_v34 }
  0x52   :  { %342 = vmatprep.mubr.bf16.mxu0 %v662_v0  ;;  %415 = vmatprep.mubr.bf16.mxu1 %v662_v0 }
  0x59   :  { %343 = vmatmul.mubr.bf16.gmra.mrb[8].mxu0 %v582_v35  ;;  %416 = vmatmul.mubr.bf16.gmra.mrb[8].mxu1 %v582_v35 }
  0x5a   :  { %352 = vmatprep.mubr.bf16.mxu0 %v662_v0  ;;  %425 = vmatprep.mubr.bf16.mxu1 %v662_v0 }
  0x61   :  { %353 = vmatmul.mubr.bf16.gmra.mrb[12].mxu0 %v583_v36  ;;  %426 = vmatmul.mubr.bf16.gmra.mrb[12].mxu1 %v583_v36 }
 0x11c   :  { %v324_v48 = vpop.f32.mrb[0].mxu0  ;;  %v397_v49 = vpop.f32.mrb[0].mxu1 }
 0x11d   :  { %v325_v50 = vadd.f32 %v324_v48, %v721_v44  ;;  %v398_v51 = vadd.f32 %v397_v49, %v723_v45  ;;  %v326_v52 = vpop.f32.mrb[1].mxu0  ;;  %v399_v53 = vpop.f32.mrb[1].mxu1 }
 0x11e   :  { %v327_v54 = vadd.f32 %v326_v52, %v725_v46  ;;  %v400_v55 = vadd.f32 %v399_v53, %v727_v47  ;;  %v328_v56 = vpop.f32.mrb[2].mxu0  ;;  %v401_v57 = vpop.f32.mrb[2].mxu1 }
 0x11f   :  { %436 = vst [vmem:[#allocation7] sm:$0xff] %v325_v50  ;;  %438 = vst [vmem:[#allocation7 + $0x10] sm:$0xff] %v398_v51  ;;  %v329_v58 = vadd.f32 %v328_v56, %v721_v44  ;;  %v402_v59 = vadd.f32 %v401_v57, %v723_v45  ;;  %v330_v60 = vpop.f32.mrb[3].mxu0  ;;  %v403_v61 = vpop.f32.mrb[3].mxu1 }
 0x120   :  { %437 = vst [vmem:[#allocation7 + $0x8] sm:$0xff] %v327_v54  ;;  %439 = vst [vmem:[#allocation7 + $0x18] sm:$0xff] %v400_v55  ;;  %v331_v62 = vadd.f32 %v330_v60, %v725_v46  ;;  %v404_v63 = vadd.f32 %v403_v61, %v727_v47 }
 0x121   :  { %440 = vst [vmem:[#allocation7 + $0x20] sm:$0xff] %v329_v58  ;;  %442 = vst [vmem:[#allocation7 + $0x30] sm:$0xff] %v402_v59 }
 0x122   :  { %441 = vst [vmem:[#allocation7 + $0x28] sm:$0xff] %v331_v62  ;;  %443 = vst [vmem:[#allocation7 + $0x38] sm:$0xff] %v404_v63 }
 0x124   :  { %v334_v0 = vpop.f32.mrb[4].mxu0  ;;  %v407_v1 = vpop.f32.mrb[4].mxu1 }
 0x125   :  { %v335_v2 = vadd.f32 %v334_v0, %v721_v44  ;;  %v408_v3 = vadd.f32 %v407_v1, %v723_v45  ;;  %v336_v4 = vpop.f32.mrb[5].mxu0  ;;  %v409_v5 = vpop.f32.mrb[5].mxu1 }
 0x126   :  { %v337_v6 = vadd.f32 %v336_v4, %v725_v46  ;;  %v410_v7 = vadd.f32 %v409_v5, %v727_v47  ;;  %v338_v8 = vpop.f32.mrb[6].mxu0  ;;  %v411_v9 = vpop.f32.mrb[6].mxu1 }
 0x127   :  { %444 = vst [vmem:[#allocation7 + $0x40] sm:$0xff] %v335_v2  ;;  %446 = vst [vmem:[#allocation7 + $0x50] sm:$0xff] %v408_v3  ;;  %v339_v10 = vadd.f32 %v338_v8, %v721_v44  ;;  %v412_v11 = vadd.f32 %v411_v9, %v723_v45  ;;  %v340_v12 = vpop.f32.mrb[7].mxu0  ;;  %v413_v13 = vpop.f32.mrb[7].mxu1 }
 0x128   :  { %445 = vst [vmem:[#allocation7 + $0x48] sm:$0xff] %v337_v6  ;;  %447 = vst [vmem:[#allocation7 + $0x58] sm:$0xff] %v410_v7  ;;  %v341_v14 = vadd.f32 %v340_v12, %v725_v46  ;;  %v414_v15 = vadd.f32 %v413_v13, %v727_v47 }
 0x129   :  { %448 = vst [vmem:[#allocation7 + $0x60] sm:$0xff] %v339_v10  ;;  %450 = vst [vmem:[#allocation7 + $0x70] sm:$0xff] %v412_v11 }
 0x12a   :  { %449 = vst [vmem:[#allocation7 + $0x68] sm:$0xff] %v341_v14  ;;  %451 = vst [vmem:[#allocation7 + $0x78] sm:$0xff] %v414_v15 }
 0x12c   :  { %v344_v16 = vpop.f32.mrb[8].mxu0  ;;  %v417_v17 = vpop.f32.mrb[8].mxu1 }
 0x12d   :  { %v345_v18 = vadd.f32 %v344_v16, %v721_v44  ;;  %v418_v19 = vadd.f32 %v417_v17, %v723_v45  ;;  %v346_v20 = vpop.f32.mrb[9].mxu0  ;;  %v419_v21 = vpop.f32.mrb[9].mxu1 }
 0x12e   :  { %v347_v22 = vadd.f32 %v346_v20, %v725_v46  ;;  %v420_v23 = vadd.f32 %v419_v21, %v727_v47  ;;  %v348_v24 = vpop.f32.mrb[10].mxu0  ;;  %v421_v25 = vpop.f32.mrb[10].mxu1 }
 0x12f   :  { %452 = vst [vmem:[#allocation7 + $0x80] sm:$0xff] %v345_v18  ;;  %454 = vst [vmem:[#allocation7 + $0x90] sm:$0xff] %v418_v19  ;;  %v349_v26 = vadd.f32 %v348_v24, %v721_v44  ;;  %v422_v27 = vadd.f32 %v421_v25, %v723_v45  ;;  %v350_v28 = vpop.f32.mrb[11].mxu0  ;;  %v423_v29 = vpop.f32.mrb[11].mxu1 }
 0x130   :  { %453 = vst [vmem:[#allocation7 + $0x88] sm:$0xff] %v347_v22  ;;  %455 = vst [vmem:[#allocation7 + $0x98] sm:$0xff] %v420_v23  ;;  %v351_v30 = vadd.f32 %v350_v28, %v725_v46  ;;  %v424_v31 = vadd.f32 %v423_v29, %v727_v47 }
 0x131   :  { %456 = vst [vmem:[#allocation7 + $0xa0] sm:$0xff] %v349_v26  ;;  %458 = vst [vmem:[#allocation7 + $0xb0] sm:$0xff] %v422_v27 }
 0x132   :  { %457 = vst [vmem:[#allocation7 + $0xa8] sm:$0xff] %v351_v30  ;;  %459 = vst [vmem:[#allocation7 + $0xb8] sm:$0xff] %v424_v31 }
 0x134   :  { %v354_v32 = vpop.f32.mrb[12].mxu0  ;;  %v427_v33 = vpop.f32.mrb[12].mxu1 }
 0x135   :  { %v355_v34 = vadd.f32 %v354_v32, %v721_v44  ;;  %v428_v35 = vadd.f32 %v427_v33, %v723_v45  ;;  %v356_v36 = vpop.f32.mrb[13].mxu0  ;;  %v429_v37 = vpop.f32.mrb[13].mxu1 }
 0x136   :  { %v357_v38 = vadd.f32 %v356_v36, %v725_v46  ;;  %v430_v39 = vadd.f32 %v429_v37, %v727_v47  ;;  %v358_v40 = vpop.f32.mrb[14].mxu0  ;;  %v431_v41 = vpop.f32.mrb[14].mxu1 }
 0x137   :  { %460 = vst [vmem:[#allocation7 + $0xc0] sm:$0xff] %v355_v34  ;;  %462 = vst [vmem:[#allocation7 + $0xd0] sm:$0xff] %v428_v35  ;;  %v359_v42 = vadd.f32 %v358_v40, %v721_v44  ;;  %v432_v43 = vadd.f32 %v431_v41, %v723_v45  ;;  %v360_v48 = vpop.f32.mrb[15].mxu0  ;;  %v433_v49 = vpop.f32.mrb[15].mxu1 }
 0x138   :  { %461 = vst [vmem:[#allocation7 + $0xc8] sm:$0xff] %v357_v38  ;;  %463 = vst [vmem:[#allocation7 + $0xd8] sm:$0xff] %v430_v39  ;;  %v361_v50 = vadd.f32 %v360_v48, %v725_v46  ;;  %v434_v51 = vadd.f32 %v433_v49, %v727_v47 }
 0x139   :  { %464 = vst [vmem:[#allocation7 + $0xe0] sm:$0xff] %v359_v42  ;;  %466 = vst [vmem:[#allocation7 + $0xf0] sm:$0xff] %v432_v43 }
 0x13a   :  { %465 = vst [vmem:[#allocation7 + $0xe8] sm:$0xff] %v361_v50  ;;  %467 = vst [vmem:[#allocation7 + $0xf8] sm:$0xff] %v434_v51 }
 0x13b   :  { %639 = shalt.err (!%p636_p6)
}
 0x13c   :  { %s640_s17 = scalar_lea.hbm %s776_s3, 4096 }
 0x13d   :  { %p641_p7 = scmp.ne.s32.totalorder %s776_s3, %s640_s17  ;;  %p644_p8 = scmp.lt.u32.totalorder %s640_s17, %s776_s3 }
 0x13f   :  { %p646_p9 = pnand %p644_p8, %p641_p7 }
 0x141   :  { %649 = shalt.err (!%p646_p9)
}
 0x142   :  { %s664_s22 = smov 512   ;;  %s665_s23 = smov 32  }
 0x143   :  { %479 = dma.vmem_to_hbm [thread:$0]  %s474_s13, 4096, %s776_s3, [#allocation4], %s664_s22, %s664_s22, %s665_s23  }
 0x144   :  { %654 = dma.done.wait [#allocation4], 4096  }
 0x145   :  { %655 = vsyncadd [#allocation4], 4294963200 }
 0x146   :  { %483 = vsyncpa [#allocation3], 1 }
 0x147   :  { %484 = vsyncpa [#allocation6], 1 }
 0x148   :  { %485 = vsyncpa [#allocation4], 1 }

</bundles_post_ra>
